<compile_context>
chip_gen: v6e
topology: v6e:2x2x1
jax: 0.10.0
libtpu: 0.0.40
codegen_flags: <defaults>
</compile_context>

<pallas_src>
import jax
import jax.numpy as jnp
from jax.experimental import pallas as pl
from jax.experimental.pallas import tpu as pltpu

# VMEM sizing, conservative across generations (v7x has only 64 MiB physical).
_VMEM_LIMIT_BYTES = 48 * 1024 * 1024    # scoped VMEM requested from compiler
_VMEM_BUDGET_BYTES = 40 * 1024 * 1024   # what our own tiles are sized against
_W_TILE_BUDGET_BYTES = 16 * 1024 * 1024  # max resident (IN, tn) weight slab


def _round_up(a, m):
    return ((a + m - 1) // m) * m


def _single_layer_kernel(x_ref, w_ref, b_ref, o_ref):
    # y = x @ W + b ; out = (tanh(y) + 1) / 2
    # MXU matmul with f32 accumulation, bias add on VPU, tanh on EUP.
    y = jnp.dot(x_ref[...], w_ref[...], preferred_element_type=jnp.float32)
    y = y + b_ref[...]                       # (tm, tn) + (1, tn) broadcast
    o_ref[...] = ((jnp.tanh(y) + 1.0) * 0.5).astype(o_ref.dtype)


@jax.jit
def single_layer_network(x, w_t, b):
    """Forward of SingleLayerNetwork: (tanh(x @ w_t + b) + 1) / 2.

    x:   (B, IN)   float32
    w_t: (IN, OUT) float32  (transposed nn.Linear weight)
    b:   (OUT,)    float32
    returns (B, OUT) float32
    """
    B, IN = x.shape
    OUT = w_t.shape[1]
    b2d = b.reshape(1, OUT)

    # ---- output-feature tiling -------------------------------------------
    # Lane-pad OUT only when it is already >= 128 (amplification small, stores
    # become unmasked); small OUT keeps its true width to avoid 8x dead work.
    if OUT >= 128:
        out_eff = _round_up(OUT, 128)
        w_bytes = IN * out_eff * 4
        if w_bytes > _W_TILE_BUDGET_BYTES:
            # N-tile the weight so the resident slab fits VMEM (v7x: 64 MiB).
            max_tn = max(128, (_W_TILE_BUDGET_BYTES // (IN * 4)) // 128 * 128)
            tn = min(out_eff, max_tn)
        else:
            tn = out_eff
        out_t = _round_up(out_eff, tn)
    else:
        tn = OUT
        out_t = OUT
    n_n = out_t // tn

    if out_t != OUT:
        w_t = jnp.pad(w_t, ((0, 0), (0, out_t - OUT)))
        b2d = jnp.pad(b2d, ((0, 0), (0, out_t - OUT)))

    # ---- batch tiling ------------------------------------------------------
    # Cap tm from the VMEM budget: resident weight/bias slab plus
    # double-buffered x and out tiles; then shrink tm to B to avoid padding.
    per_row_bytes = 2 * 4 * (IN + tn)        # dbl-buffered x row + out row (f32)
    tm_cap = (_VMEM_BUDGET_BYTES - IN * tn * 4 - tn * 4) // per_row_bytes
    tm_cap = max(8, min(4096, (tm_cap // 8) * 8))

    min_steps = 2 if B >= 16 else 1          # keep v7x's 2nd TensorCore busy
    n_b = max(pl.cdiv(B, tm_cap), min_steps)
    tm = min(tm_cap, _round_up(pl.cdiv(B, n_b), 8))
    n_b = pl.cdiv(B, tm)
    b_pad = n_b * tm
    if b_pad != B:
        x = jnp.pad(x, ((0, b_pad - B), (0, 0)))

    out = pl.pallas_call(
        _single_layer_kernel,
        out_shape=jax.ShapeDtypeStruct((b_pad, out_t), jnp.float32),
        grid=(n_n, n_b),                     # weight axis outer: each slab DMA'd once
        in_specs=[
            pl.BlockSpec((tm, IN), lambda j, i: (i, 0)),   # x marches over batch
            pl.BlockSpec((IN, tn), lambda j, i: (0, j)),   # weight slab resident per j
            pl.BlockSpec((1, tn), lambda j, i: (0, j)),    # bias slab resident per j
        ],
        out_specs=pl.BlockSpec((tm, tn), lambda j, i: (i, j)),
        compiler_params=pltpu.CompilerParams(
            dimension_semantics=("parallel", "parallel"),
            vmem_limit_bytes=_VMEM_LIMIT_BYTES,
        ),
    )(x, w_t, b2d)

    if b_pad != B or out_t != OUT:
        out = out[:B, :OUT]
    return out


if __name__ == "__main__":
    # Small shapes consistent with nn.Linear(input_size, output_size).
    batch, input_size, output_size = 8, 32, 16

    key = jax.random.PRNGKey(0)
    kx, kw, kb = jax.random.split(key, 3)

    x = jax.random.normal(kx, (batch, input_size), dtype=jnp.float32)
    # Deterministic parameter init (PyTorch-default-like uniform range).
    bound = 1.0 / (input_size ** 0.5)
    w = jax.random.uniform(kw, (output_size, input_size),
                           minval=-bound, maxval=bound, dtype=jnp.float32)
    b = jax.random.uniform(kb, (output_size,),
                           minval=-bound, maxval=bound, dtype=jnp.float32)

    out = single_layer_network(x, w.T, b)
    jax.block_until_ready(out)

    # Reference check in plain JAX.
    ref = (jnp.tanh(x @ w.T + b) + 1.0) / 2.0
    assert out.shape == ref.shape
    assert jnp.allclose(out, ref, atol=1e-5, rtol=1e-5), \
        float(jnp.max(jnp.abs(out - ref)))

    print("KERNEL_OK")
</pallas_src>

<mosaic_0001>
module attributes {stable_mosaic.version = 11 : i64} {
  func.func @_single_layer_kernel(%arg0: i32, %arg1: i32, %arg2: memref<8x32xf32, #tpu.memory_space<vmem>>, %arg3: memref<32x16xf32, #tpu.memory_space<vmem>>, %arg4: memref<1x16xf32, #tpu.memory_space<vmem>>, %arg5: memref<8x16xf32, #tpu.memory_space<vmem>>) attributes {dimension_semantics = [#tpu.dimension_semantics<parallel>, #tpu.dimension_semantics<parallel>], iteration_bounds = array<i64: 1, 1>, scalar_prefetch = 0 : i64, scratch_operands = 0 : i64, tpu.core_type = #tpu.core_type<tc>, window_params = [{transform_indices = @transform_0, window_bounds = array<i64: 8, 32>}, {transform_indices = @transform_1, window_bounds = array<i64: 32, 16>}, {transform_indices = @transform_2, window_bounds = array<i64: 1, 16>}, {transform_indices = @transform_3, window_bounds = array<i64: 8, 16>}]} {
    %c0 = arith.constant 0 : index
    %c0_0 = arith.constant 0 : index
    %0 = vector.load %arg2[%c0, %c0_0] : memref<8x32xf32, #tpu.memory_space<vmem>>, vector<8x32xf32>
    %c0_1 = arith.constant 0 : index
    %c0_2 = arith.constant 0 : index
    %1 = vector.load %arg3[%c0_1, %c0_2] : memref<32x16xf32, #tpu.memory_space<vmem>>, vector<32x16xf32>
    %cst = arith.constant dense<0.000000e+00> : vector<8x16xf32>
    %2 = tpu.matmul %0, %1, %cst {dimension_numbers = #tpu.dot_dimension_numbers<[1], [0], [0], [1], [0, 0, 1, 1], [], []>} : vector<8x32xf32>, vector<32x16xf32>, vector<8x16xf32> -> vector<8x16xf32>
    %c0_3 = arith.constant 0 : index
    %c0_4 = arith.constant 0 : index
    %3 = vector.load %arg4[%c0_3, %c0_4] : memref<1x16xf32, #tpu.memory_space<vmem>>, vector<1x16xf32>
    %4 = vector.broadcast %3 : vector<1x16xf32> to vector<8x16xf32>
    %5 = arith.addf %2, %4 : vector<8x16xf32>
    %6 = math.tanh %5 : vector<8x16xf32>
    %cst_5 = arith.constant 1.000000e+00 : f32
    %7 = vector.broadcast %cst_5 : f32 to vector<8x16xf32>
    %8 = arith.addf %6, %7 : vector<8x16xf32>
    %cst_6 = arith.constant 5.000000e-01 : f32
    %9 = vector.broadcast %cst_6 : f32 to vector<8x16xf32>
    %10 = arith.mulf %8, %9 : vector<8x16xf32>
    %c0_7 = arith.constant 0 : index
    %c0_8 = arith.constant 0 : index
    %11 = vector.load %arg5[%c0_7, %c0_8] : memref<8x16xf32, #tpu.memory_space<vmem>>, vector<8x16xf32>
    tpu.vector_store %arg5[%c0_7, %c0_8], %10 {strides = array<i32>} : memref<8x16xf32, #tpu.memory_space<vmem>>, vector<8x16xf32>,
    return
  }
  func.func @transform_0(%arg0: i32, %arg1: i32) -> (i32, i32) {
    %c0_i32 = arith.constant 0 : i32
    %c0_i32_0 = arith.constant 0 : i32
    return %arg1, %c0_i32 : i32, i32
  }
  func.func @transform_1(%arg0: i32, %arg1: i32) -> (i32, i32) {
    %c0_i32 = arith.constant 0 : i32
    %c0_i32_0 = arith.constant 0 : i32
    return %c0_i32, %arg0 : i32, i32
  }
  func.func @transform_2(%arg0: i32, %arg1: i32) -> (i32, i32) {
    %c0_i32 = arith.constant 0 : i32
    %c0_i32_0 = arith.constant 0 : i32
    return %c0_i32, %arg0 : i32, i32
  }
  func.func @transform_3(%arg0: i32, %arg1: i32) -> (i32, i32) {
    %c0_i32 = arith.constant 0 : i32
    return %arg1, %arg0 : i32, i32
  }
}

</mosaic_0001>

<bundles_post_ra>
// kernel: single_layer_network.1
= control target key start
LH: loop header
LB: loop body
LE: loop exit
PB: predicated region body
PF: predicated region fallthrough
CT: control target
= control target key end

     0   :  { %v165_v1 = vmov 0.0   ;;  %vm166_vm0 = vmmov 0   ;;  %s209_s0 = inlined_call_operand.vmem [shape: f32[8,32], index: 0, kind: input, shape index: {}]   ;;  %s210_s1 = inlined_call_operand.vmem [shape: f32[32,16], index: 1, kind: input, shape index: {}]   ;;  %s211_s2 = inlined_call_operand.vmem [shape: f32[1,16], index: 2, kind: input, shape index: {}]   ;;  %s212_s3 = inlined_call_operand.hbm [shape: f32[8,16], index: 3, kind: output, shape index: {}]  }
   0x1   :  { %v19_v0 = vld [vmem:[%s210_s1 + $0x18] sm:$0xff]  ;;  %127 = vmatprep.subr.mxu0 %v165_v1  ;;  %v18_v2 = vld [vmem:[%s210_s1 + $0x10] sm:$0xff]  ;;  %135 = vmatprep.mubr.msk.f32.mxu0 %vm166_vm0, %v165_v1 }
   0x2   :  { %128 = vmatpush3.msra.mxu0 %v19_v0 }
   0x3   :  { %8 = vsyncpa [#allocation3], 0  ;;  %129 = vmatprep.subr.mxu0 %v165_v1  ;;  %v17_v3 = vld [vmem:[%s210_s1 + $0x8] sm:$0xff]  ;;  %v16_v4 = vld [vmem:[%s210_s1] sm:$0xff]  ;;  %vm27_vm1 = vcmask 261120   ;;  %s167_s24 = smov [#allocation2]  }
   0x4   :  { %130 = vmatpush3.msra.mxu0 %v18_v2  ;;  %v15_v5 = vld [vmem:[%s209_s0] sm:$0xff]  ;;  %s112_s1 = sshll.u32 %s167_s24, 4  ;;  %vm104_vm2 = vcmask 130048   ;;  %s113_s1 = int_to_ptr.vmem [resolvable:$true] %s112_s1 }
   0x5   :  { %131 = vmatprep.subr.mxu0 %v165_v1  ;;  %v120_v6 = vld [vmem:[%s211_s2] ss:$0 sm:$0xff]  ;;  %s143_s0 = scalar_lea.vmem %s113_s1, 128  ;;  %p148_p1 = scmp.lt.s32.totalorder %s113_s1, %s113_s1 }
   0x6   :  { %132 = vmatpush3.msra.mxu0 %v17_v3  ;;  %p144_p0 = scmp.ne.s32.totalorder %s113_s1, %s143_s0  ;;  %p149_p2 = scmp.lt.s32.totalorder %s143_s0, %s143_s0 }
   0x7   :  { %133 = vmatprep.subr.mxu0 %v165_v1 }
   0x8   :  { %134 = vmatpush3.msra.mxu0 %v16_v4  ;;  %p150_p3 = por %p149_p2, %p148_p1 }
   0x9   :  { %136 = vmatmul.mubr.msk.f32.vlgmr.msra.gmra.mxu0 %vm27_vm1, %v15_v5 }
   0xa   :  { %p151_p4 = pnand %p150_p3, %p144_p0 }
  0xc9   :  { %v97_v7 = vpop.f32.mrf.mxu0 }
  0xca   :  { %v98_v8 = vadd.f32 %v120_v6, %v97_v7 }
  0xcb   :  { %v137_v9 = vpop.f32.mrf.mxu0 }
  0xcc   :  { %141 = vtanh.f32 %v98_v8 }
  0xd9   :  { %v142_v10 = vpop.eup %141 }
  0xda   :  { %v102_v11 = vadd.f32 1.0, %v142_v10 }
  0xdc   :  { %v103_v12 = vmul.f32 0.5, %v102_v11 }
  0xde   :  { %105 = vst.msk [vmem:[#allocation2] sm:$0xff] %vm104_vm2, %v103_v12 }
  0xdf   :  { %154 = shalt.err (!%p151_p4)
}
  0xe0   :  { %115 = dma.vmem_to_hbm [thread:$0]  %s113_s1, 128, %s212_s3, [#allocation3]  }
  0xe1   :  { %163 = dma.done.wait [#allocation3], 128  }
  0xe2   :  { %164 = vsyncadd [#allocation3], 4294967168 }
  0xe3   :  { %119 = vsyncpa [#allocation3], 1 }

</bundles_post_ra>
